<compile_context>
chip_gen: v6e
topology: v6e:2x2x1
jax: 0.10.0
libtpu: 0.0.40
codegen_flags: <defaults>
</compile_context>

<pallas_src>
import functools

import jax
import jax.numpy as jnp
import numpy as np
from jax.experimental import pallas as pl
from jax.experimental.pallas import tpu as pltpu

EPS = 1e-5


def _round_up(v, m):
    return (v + m - 1) // m * m


def _pick_group(n, per_img, target_lanes=2048):
    """Images per tile: ~2K-8K lanes per tile, divides N, keeps TM % 128 == 0."""
    g = max(1, min(n, target_lanes // max(per_img, 1)))
    for cand in range(g, 0, -1):
        if n % cand == 0 and (cand * per_img) % 128 == 0:
            return cand
    # Fallback: a single tile (block == full array dims, so no 128 constraint).
    # TODO(synk): halo-based within-image M tiling for very large single images.
    return n


def _tap_masks(g, hp, wp):
    """(9, TM) f32 {0,1} validity per 3x3 tap (implements padding=1).

    Tiny and grid-invariant -> passed once and kept resident (constant
    index_map) instead of generating per-lane coords in-kernel (avoids vector
    integer div/mod lowering risk) or streaming a (9, M) slab per tile.
    """
    per = hp * wp
    tm = g * per
    r = np.arange(tm) % per
    yy = r // wp
    xx = r % wp
    rows = []
    for dy in range(3):
        for dx in range(3):
            ok = ((yy + dy - 1 >= 0) & (yy + dy - 1 <= hp - 1)
                  & (xx + dx - 1 >= 0) & (xx + dx - 1 <= wp - 1))
            rows.append(ok.astype(np.float32))
    return jnp.asarray(np.stack(rows, axis=0))           # (9, TM) f32


def _conv3x3_taps(act_f32, w_ref, masks, wp):
    """3x3 same-conv as 9 accumulating per-tap MXU matmuls.

    act_f32: (Ci_p, TM) f32 in registers.  w_ref: VMEM ref (9, Co_p, Ci_p) bf16.
    masks:   (9, TM) f32 0/1.  Returns (Co_p, TM) f32.
    Per tap: pltpu.roll on the lane axis (XLU), boundary-mask multiply (VPU),
    bf16 cast, one MXU matmul with K = Ci_p.  Rolls are done in f32 and the
    operand is cast to bf16 afterwards (bit-identical to rolling bf16, since
    masked values are exact 0/1 products of already-bf16 data).
    """
    tm = act_f32.shape[-1]
    acc = None
    for t in range(9):
        dy, dx = t // 3, t % 3
        s = (dy - 1) * wp + (dx - 1)                      # static source offset
        src = act_f32 if s == 0 else pltpu.roll(act_f32, (-s) % tm, axis=1)
        if t != 4:                                        # center tap: all-valid
            src = src * masks[t:t + 1, :]                 # zero wrap/boundary lanes
        part = jnp.dot(w_ref[t], src.astype(jnp.bfloat16),
                       preferred_element_type=jnp.float32)
        acc = part if acc is None else acc + part
    return acc


def _stats_kernel(xp_ref, w1_ref, mask_ref, mean_ref, m2_ref, *, wp):
    """Pass 1: conv1 on this M tile -> per-tile per-channel mean & centered M2."""
    masks = mask_ref[...]
    act = xp_ref[...].astype(jnp.float32)                 # (Cin_p, TM)
    acc1 = _conv3x3_taps(act, w1_ref, masks, wp)          # (Cmid_p, TM) f32
    inv_tm = 1.0 / float(acc1.shape[-1])
    mu = jnp.sum(acc1, axis=1, keepdims=True) * inv_tm    # (Cmid_p, 1)
    d = acc1 - mu
    mean_ref[0] = mu
    m2_ref[0] = jnp.sum(d * d, axis=1, keepdims=True)


def _apply_kernel(xp_ref, w1_ref, s1_ref, t1_ref, w2_ref, mask_ref,
                  z2_ref, mean_ref, m2_ref, *, wp):
    """Pass 2: conv1 (recomputed) -> BN1+ReLU -> conv2 raw slab + BN2 partials."""
    masks = mask_ref[...]
    act = xp_ref[...].astype(jnp.float32)
    acc1 = _conv3x3_taps(act, w1_ref, masks, wp)                    # (Cmid_p, TM)
    y1 = jnp.maximum(acc1 * s1_ref[...] + t1_ref[...], 0.0)         # BN1 + ReLU
    acc2 = _conv3x3_taps(y1, w2_ref, masks, wp)                     # (Cout_p, TM)
    z2_ref[...] = acc2                                              # lane-dense store
    inv_tm = 1.0 / float(acc2.shape[-1])
    mu = jnp.sum(acc2, axis=1, keepdims=True) * inv_tm
    d = acc2 - mu
    mean_ref[0] = mu
    m2_ref[0] = jnp.sum(d * d, axis=1, keepdims=True)


def _combine_stats(mean_parts, m2_parts, count_per_tile):
    """Chan's parallel-variance combine over equal-count tiles (stable)."""
    nt = mean_parts.shape[0]
    gmean = jnp.mean(mean_parts, axis=0)                            # (C, 1)
    m2 = (jnp.sum(m2_parts, axis=0)
          + count_per_tile * jnp.sum((mean_parts - gmean[None, :, :]) ** 2, axis=0))
    var = m2 / float(nt * count_per_tile)                           # biased (PyTorch BN)
    return gmean, var


def _prep_w(w_oihw, co_pad, ci_pad):
    """OIHW -> (9, Co_pad, Ci_pad) bf16, tap index t = dy*3 + dx."""
    co, ci = w_oihw.shape[0], w_oihw.shape[1]
    w = jnp.transpose(w_oihw.astype(jnp.float32), (2, 3, 0, 1)).reshape(9, co, ci)
    w = jnp.pad(w, ((0, 0), (0, co_pad - co), (0, ci_pad - ci)))
    return w.astype(jnp.bfloat16)


def _pad_vec(v, c_pad):
    v = v.astype(jnp.float32).reshape(-1, 1)
    return jnp.pad(v, ((0, c_pad - v.shape[0]), (0, 0)))


def down_forward(x_nchw, w1_oihw, g1, b1, w2_oihw, g2, b2):
    """Down.forward.  x_nchw: (N, Cin, H, W) f32 -> (N, Cout, H//2, W//2) f32."""
    N, Cin, H, W = x_nchw.shape
    Cmid = w1_oihw.shape[0]
    Cout = w2_oihw.shape[0]
    Hp, Wp = H // 2, W // 2
    per_img = Hp * Wp
    M = N * per_img

    cin_p = _round_up(Cin, 16)       # 16: bf16 sublane packing
    cmid_p = _round_up(Cmid, 16)
    cout_p = _round_up(Cout, 16)     # pad Cout too -> unmasked sublane stores

    G = _pick_group(N, per_img)      # images per M tile
    TM = G * per_img
    nt = M // TM

    # --- glue: fused 2x2 maxpool + NCHW -> channel-major (C, M) bf16 slab.
    # TODO(synk): when chained with other (C, M)-layout Pallas blocks, fuse the
    # pool into the per-tile input read and drop both wrapper transposes.
    x = x_nchw.astype(jnp.float32)[:, :, :2 * Hp, :2 * Wp]
    xp = x.reshape(N, Cin, Hp, 2, Wp, 2).max(axis=(3, 5))           # (N,Cin,Hp,Wp)
    xp = jnp.transpose(xp, (1, 0, 2, 3)).reshape(Cin, M)            # M lane-dense
    xp = jnp.pad(xp, ((0, cin_p - Cin), (0, 0))).astype(jnp.bfloat16)

    w1_k = _prep_w(w1_oihw, cmid_p, cin_p)       # (9, cmid_p, cin_p) bf16
    w2_k = _prep_w(w2_oihw, cout_p, cmid_p)      # (9, cout_p, cmid_p) bf16
    masks = _tap_masks(G, Hp, Wp)                # (9, TM) f32, resident

    # 48 MiB is safe on v7x (64 MiB physical); raise toward ~96-100 MiB on
    # v5e/v6e if larger M tiles are wanted.
    cparams = pltpu.CompilerParams(
        dimension_semantics=("parallel",),
        vmem_limit_bytes=48 * 1024 * 1024)

    def const(shape):
        # Grid-invariant operand: constant index_map keeps it resident across
        # M tiles (single-buffering via pl.Buffered(1) would save a bit more
        # VMEM but these operands are tiny).
        return pl.BlockSpec(shape, lambda i, _s=len(shape): (0,) * _s)

    # --- pass 1: per-tile conv1 BN partial stats -------------------------------
    mean1_p, m21_p = pl.pallas_call(
        functools.partial(_stats_kernel, wp=Wp),
        grid=(nt,),
        in_specs=[pl.BlockSpec((cin_p, TM), lambda i: (0, i)),
                  const((9, cmid_p, cin_p)),
                  const((9, TM))],
        out_specs=[pl.BlockSpec((1, cmid_p, 1), lambda i: (i, 0, 0)),
                   pl.BlockSpec((1, cmid_p, 1), lambda i: (i, 0, 0))],
        out_shape=[jax.ShapeDtypeStruct((nt, cmid_p, 1), jnp.float32),
                   jax.ShapeDtypeStruct((nt, cmid_p, 1), jnp.float32)],
        compiler_params=cparams,
    )(xp, w1_k, masks)

    mu1, var1 = _combine_stats(mean1_p, m21_p, TM)
    scale1 = _pad_vec(g1, cmid_p) * jax.lax.rsqrt(var1 + EPS)
    shift1 = _pad_vec(b1, cmid_p) - mu1 * scale1

    # --- pass 2: conv1 (recomputed) -> BN1+ReLU -> conv2 raw + BN2 partials ----
    z2, mean2_p, m22_p = pl.pallas_call(
        functools.partial(_apply_kernel, wp=Wp),
        grid=(nt,),
        in_specs=[pl.BlockSpec((cin_p, TM), lambda i: (0, i)),
                  const((9, cmid_p, cin_p)),
                  const((cmid_p, 1)), const((cmid_p, 1)),
                  const((9, cout_p, cmid_p)),
                  const((9, TM))],
        out_specs=[pl.BlockSpec((cout_p, TM), lambda i: (0, i)),
                   pl.BlockSpec((1, cout_p, 1), lambda i: (i, 0, 0)),
                   pl.BlockSpec((1, cout_p, 1), lambda i: (i, 0, 0))],
        out_shape=[jax.ShapeDtypeStruct((cout_p, M), jnp.float32),
                   jax.ShapeDtypeStruct((nt, cout_p, 1), jnp.float32),
                   jax.ShapeDtypeStruct((nt, cout_p, 1), jnp.float32)],
        compiler_params=cparams,
    )(xp, w1_k, scale1, shift1, w2_k, masks)

    mu2, var2 = _combine_stats(mean2_p, m22_p, TM)
    scale2 = _pad_vec(g2, cout_p) * jax.lax.rsqrt(var2 + EPS)
    shift2 = _pad_vec(b2, cout_p) - mu2 * scale2

    # --- glue: BN2 + ReLU fused into the (anyway required) NCHW writeback pass.
    out_cm = jnp.maximum(z2 * scale2 + shift2, 0.0)[:Cout]           # (Cout, M)
    return jnp.transpose(out_cm.reshape(Cout, N, Hp, Wp), (1, 0, 2, 3))


def _reference_down(x, w1, g1, b1, w2, g2, b2):
    """Pure-JAX f32 reference (NCHW), mirrors PyTorch Down in training mode."""
    y = jax.lax.reduce_window(x, -jnp.inf, jax.lax.max,
                              (1, 1, 2, 2), (1, 1, 2, 2), 'VALID')

    def conv_bn_relu(y, w, g, b):
        y = jax.lax.conv_general_dilated(
            y, w, (1, 1), ((1, 1), (1, 1)),
            dimension_numbers=('NCHW', 'OIHW', 'NCHW'))
        mu = jnp.mean(y, axis=(0, 2, 3), keepdims=True)
        var = jnp.mean((y - mu) ** 2, axis=(0, 2, 3), keepdims=True)
        y = (y - mu) * jax.lax.rsqrt(var + EPS)
        y = y * g.reshape(1, -1, 1, 1) + b.reshape(1, -1, 1, 1)
        return jnp.maximum(y, 0.0)

    y = conv_bn_relu(y, w1, g1, b1)
    y = conv_bn_relu(y, w2, g2, b2)
    return y


if __name__ == "__main__":
    # Down(in_channels=4, out_channels=8); mid_channels defaults to out_channels.
    N, Cin, H, W = 2, 4, 16, 16
    Cout = 8
    Cmid = Cout

    key = jax.random.PRNGKey(0)
    kx, k1, k2 = jax.random.split(key, 3)
    x = jax.random.normal(kx, (N, Cin, H, W), jnp.float32)
    w1 = jax.random.normal(k1, (Cmid, Cin, 3, 3), jnp.float32) * 0.1
    w2 = jax.random.normal(k2, (Cout, Cmid, 3, 3), jnp.float32) * 0.1
    # BatchNorm affine params (PyTorch default init: weight=1, bias=0)
    g1 = jnp.ones((Cmid,), jnp.float32)
    b1 = jnp.zeros((Cmid,), jnp.float32)
    g2 = jnp.ones((Cout,), jnp.float32)
    b2 = jnp.zeros((Cout,), jnp.float32)

    out = jax.block_until_ready(down_forward(x, w1, g1, b1, w2, g2, b2))
    ref = jax.block_until_ready(_reference_down(x, w1, g1, b1, w2, g2, b2))

    assert out.shape == (N, Cout, H // 2, W // 2), out.shape
    err = float(jnp.max(jnp.abs(out - ref)))
    # bf16 MXU operands (per perf review) -> tolerance loosened vs f32 reference.
    assert jnp.allclose(out, ref, atol=5e-2, rtol=5e-2), err

    print("KERNEL_OK")
</pallas_src>

<mosaic_0001>
module attributes {stable_mosaic.version = 11 : i64} {
  func.func @_stats_kernel(%arg0: i32, %arg1: memref<16x128xbf16, #tpu.memory_space<vmem>>, %arg2: memref<9x16x16xbf16, #tpu.memory_space<vmem>>, %arg3: memref<9x128xf32, #tpu.memory_space<vmem>>, %arg4: memref<1x16x1xf32, #tpu.memory_space<vmem>>, %arg5: memref<1x16x1xf32, #tpu.memory_space<vmem>>) attributes {dimension_semantics = [#tpu.dimension_semantics<parallel>], iteration_bounds = array<i64: 1>, scalar_prefetch = 0 : i64, scratch_operands = 0 : i64, tpu.core_type = #tpu.core_type<tc>, window_params = [{transform_indices = @transform_0, window_bounds = array<i64: 16, 128>}, {pipeline_mode = #tpu.pipeline_mode<synchronous>, transform_indices = @transform_1, window_bounds = array<i64: 9, 16, 16>}, {pipeline_mode = #tpu.pipeline_mode<synchronous>, transform_indices = @transform_2, window_bounds = array<i64: 9, 128>}, {transform_indices = @transform_3, window_bounds = array<i64: 1, 16, 1>}, {transform_indices = @transform_4, window_bounds = array<i64: 1, 16, 1>}]} {
    %c0 = arith.constant 0 : index
    %c0_0 = arith.constant 0 : index
    %0 = vector.load %arg3[%c0, %c0_0] : memref<9x128xf32, #tpu.memory_space<vmem>>, vector<9x128xf32>
    %c0_1 = arith.constant 0 : index
    %c0_2 = arith.constant 0 : index
    %1 = vector.load %arg1[%c0_1, %c0_2] : memref<16x128xbf16, #tpu.memory_space<vmem>>, vector<16x128xbf16>
    %2 = arith.extf %1 : vector<16x128xbf16> to vector<16x128xf32>
    %c9_i32 = arith.constant 9 : i32
    %3 = tpu.dynamic_rotate %2 by %c9_i32 dim 1 : vector<16x128xf32>, i32 -> vector<16x128xf32>
    %4 = vector.extract_strided_slice %0 {offsets = [0, 0], sizes = [1, 128], strides = [1, 1]} : vector<9x128xf32> to vector<1x128xf32>
    %5 = vector.broadcast %4 : vector<1x128xf32> to vector<16x128xf32>
    %6 = arith.mulf %3, %5 : vector<16x128xf32>
    %c0_3 = arith.constant 0 : index
    %c0_4 = arith.constant 0 : index
    %c0_5 = arith.constant 0 : index
    %7 = vector.load %arg2[%c0_3, %c0_4, %c0_5] : memref<9x16x16xbf16, #tpu.memory_space<vmem>>, vector<1x16x16xbf16>
    %8 = vector.shape_cast %7 : vector<1x16x16xbf16> to vector<16x16xbf16>
    %9 = arith.truncf %6 : vector<16x128xf32> to vector<16x128xbf16>
    %cst = arith.constant dense<0.000000e+00> : vector<16x128xf32>
    %10 = tpu.matmul %8, %9, %cst {dimension_numbers = #tpu.dot_dimension_numbers<[1], [0], [0], [1], [0, 0, 1, 1], [], []>} : vector<16x16xbf16>, vector<16x128xbf16>, vector<16x128xf32> -> vector<16x128xf32>
    %c8_i32 = arith.constant 8 : i32
    %11 = tpu.dynamic_rotate %2 by %c8_i32 dim 1 : vector<16x128xf32>, i32 -> vector<16x128xf32>
    %12 = vector.extract_strided_slice %0 {offsets = [1, 0], sizes = [1, 128], strides = [1, 1]} : vector<9x128xf32> to vector<1x128xf32>
    %13 = vector.broadcast %12 : vector<1x128xf32> to vector<16x128xf32>
    %14 = arith.mulf %11, %13 : vector<16x128xf32>
    %c1 = arith.constant 1 : index
    %c0_6 = arith.constant 0 : index
    %c0_7 = arith.constant 0 : index
    %15 = vector.load %arg2[%c1, %c0_6, %c0_7] : memref<9x16x16xbf16, #tpu.memory_space<vmem>>, vector<1x16x16xbf16>
    %16 = vector.shape_cast %15 : vector<1x16x16xbf16> to vector<16x16xbf16>
    %17 = arith.truncf %14 : vector<16x128xf32> to vector<16x128xbf16>
    %cst_8 = arith.constant dense<0.000000e+00> : vector<16x128xf32>
    %18 = tpu.matmul %16, %17, %cst_8 {dimension_numbers = #tpu.dot_dimension_numbers<[1], [0], [0], [1], [0, 0, 1, 1], [], []>} : vector<16x16xbf16>, vector<16x128xbf16>, vector<16x128xf32> -> vector<16x128xf32>
    %19 = arith.addf %10, %18 : vector<16x128xf32>
    %c7_i32 = arith.constant 7 : i32
    %20 = tpu.dynamic_rotate %2 by %c7_i32 dim 1 : vector<16x128xf32>, i32 -> vector<16x128xf32>
    %21 = vector.extract_strided_slice %0 {offsets = [2, 0], sizes = [1, 128], strides = [1, 1]} : vector<9x128xf32> to vector<1x128xf32>
    %22 = vector.broadcast %21 : vector<1x128xf32> to vector<16x128xf32>
    %23 = arith.mulf %20, %22 : vector<16x128xf32>
    %c2 = arith.constant 2 : index
    %c0_9 = arith.constant 0 : index
    %c0_10 = arith.constant 0 : index
    %24 = vector.load %arg2[%c2, %c0_9, %c0_10] : memref<9x16x16xbf16, #tpu.memory_space<vmem>>, vector<1x16x16xbf16>
    %25 = vector.shape_cast %24 : vector<1x16x16xbf16> to vector<16x16xbf16>
    %26 = arith.truncf %23 : vector<16x128xf32> to vector<16x128xbf16>
    %cst_11 = arith.constant dense<0.000000e+00> : vector<16x128xf32>
    %27 = tpu.matmul %25, %26, %cst_11 {dimension_numbers = #tpu.dot_dimension_numbers<[1], [0], [0], [1], [0, 0, 1, 1], [], []>} : vector<16x16xbf16>, vector<16x128xbf16>, vector<16x128xf32> -> vector<16x128xf32>
    %28 = arith.addf %19, %27 : vector<16x128xf32>
    %c1_i32 = arith.constant 1 : i32
    %29 = tpu.dynamic_rotate %2 by %c1_i32 dim 1 : vector<16x128xf32>, i32 -> vector<16x128xf32>
    %30 = vector.extract_strided_slice %0 {offsets = [3, 0], sizes = [1, 128], strides = [1, 1]} : vector<9x128xf32> to vector<1x128xf32>
    %31 = vector.broadcast %30 : vector<1x128xf32> to vector<16x128xf32>
    %32 = arith.mulf %29, %31 : vector<16x128xf32>
    %c3 = arith.constant 3 : index
    %c0_12 = arith.constant 0 : index
    %c0_13 = arith.constant 0 : index
    %33 = vector.load %arg2[%c3, %c0_12, %c0_13] : memref<9x16x16xbf16, #tpu.memory_space<vmem>>, vector<1x16x16xbf16>
    %34 = vector.shape_cast %33 : vector<1x16x16xbf16> to vector<16x16xbf16>
    %35 = arith.truncf %32 : vector<16x128xf32> to vector<16x128xbf16>
    %cst_14 = arith.constant dense<0.000000e+00> : vector<16x128xf32>
    %36 = tpu.matmul %34, %35, %cst_14 {dimension_numbers = #tpu.dot_dimension_numbers<[1], [0], [0], [1], [0, 0, 1, 1], [], []>} : vector<16x16xbf16>, vector<16x128xbf16>, vector<16x128xf32> -> vector<16x128xf32>
    %37 = arith.addf %28, %36 : vector<16x128xf32>
    %c4 = arith.constant 4 : index
    %c0_15 = arith.constant 0 : index
    %c0_16 = arith.constant 0 : index
    %38 = vector.load %arg2[%c4, %c0_15, %c0_16] : memref<9x16x16xbf16, #tpu.memory_space<vmem>>, vector<1x16x16xbf16>
    %39 = vector.shape_cast %38 : vector<1x16x16xbf16> to vector<16x16xbf16>
    %40 = arith.truncf %2 : vector<16x128xf32> to vector<16x128xbf16>
    %cst_17 = arith.constant dense<0.000000e+00> : vector<16x128xf32>
    %41 = tpu.matmul %39, %40, %cst_17 {dimension_numbers = #tpu.dot_dimension_numbers<[1], [0], [0], [1], [0, 0, 1, 1], [], []>} : vector<16x16xbf16>, vector<16x128xbf16>, vector<16x128xf32> -> vector<16x128xf32>
    %42 = arith.addf %37, %41 : vector<16x128xf32>
    %c127_i32 = arith.constant 127 : i32
    %43 = tpu.dynamic_rotate %2 by %c127_i32 dim 1 : vector<16x128xf32>, i32 -> vector<16x128xf32>
    %44 = vector.extract_strided_slice %0 {offsets = [5, 0], sizes = [1, 128], strides = [1, 1]} : vector<9x128xf32> to vector<1x128xf32>
    %45 = vector.broadcast %44 : vector<1x128xf32> to vector<16x128xf32>
    %46 = arith.mulf %43, %45 : vector<16x128xf32>
    %c5 = arith.constant 5 : index
    %c0_18 = arith.constant 0 : index
    %c0_19 = arith.constant 0 : index
    %47 = vector.load %arg2[%c5, %c0_18, %c0_19] : memref<9x16x16xbf16, #tpu.memory_space<vmem>>, vector<1x16x16xbf16>
    %48 = vector.shape_cast %47 : vector<1x16x16xbf16> to vector<16x16xbf16>
    %49 = arith.truncf %46 : vector<16x128xf32> to vector<16x128xbf16>
    %cst_20 = arith.constant dense<0.000000e+00> : vector<16x128xf32>
    %50 = tpu.matmul %48, %49, %cst_20 {dimension_numbers = #tpu.dot_dimension_numbers<[1], [0], [0], [1], [0, 0, 1, 1], [], []>} : vector<16x16xbf16>, vector<16x128xbf16>, vector<16x128xf32> -> vector<16x128xf32>
    %51 = arith.addf %42, %50 : vector<16x128xf32>
    %c121_i32 = arith.constant 121 : i32
    %52 = tpu.dynamic_rotate %2 by %c121_i32 dim 1 : vector<16x128xf32>, i32 -> vector<16x128xf32>
    %53 = vector.extract_strided_slice %0 {offsets = [6, 0], sizes = [1, 128], strides = [1, 1]} : vector<9x128xf32> to vector<1x128xf32>
    %54 = vector.broadcast %53 : vector<1x128xf32> to vector<16x128xf32>
    %55 = arith.mulf %52, %54 : vector<16x128xf32>
    %c6 = arith.constant 6 : index
    %c0_21 = arith.constant 0 : index
    %c0_22 = arith.constant 0 : index
    %56 = vector.load %arg2[%c6, %c0_21, %c0_22] : memref<9x16x16xbf16, #tpu.memory_space<vmem>>, vector<1x16x16xbf16>
    %57 = vector.shape_cast %56 : vector<1x16x16xbf16> to vector<16x16xbf16>
    %58 = arith.truncf %55 : vector<16x128xf32> to vector<16x128xbf16>
    %cst_23 = arith.constant dense<0.000000e+00> : vector<16x128xf32>
    %59 = tpu.matmul %57, %58, %cst_23 {dimension_numbers = #tpu.dot_dimension_numbers<[1], [0], [0], [1], [0, 0, 1, 1], [], []>} : vector<16x16xbf16>, vector<16x128xbf16>, vector<16x128xf32> -> vector<16x128xf32>
    %60 = arith.addf %51, %59 : vector<16x128xf32>
    %c120_i32 = arith.constant 120 : i32
    %61 = tpu.dynamic_rotate %2 by %c120_i32 dim 1 : vector<16x128xf32>, i32 -> vector<16x128xf32>
    %62 = vector.extract_strided_slice %0 {offsets = [7, 0], sizes = [1, 128], strides = [1, 1]} : vector<9x128xf32> to vector<1x128xf32>
    %63 = vector.broadcast %62 : vector<1x128xf32> to vector<16x128xf32>
    %64 = arith.mulf %61, %63 : vector<16x128xf32>
    %c7 = arith.constant 7 : index
    %c0_24 = arith.constant 0 : index
    %c0_25 = arith.constant 0 : index
    %65 = vector.load %arg2[%c7, %c0_24, %c0_25] : memref<9x16x16xbf16, #tpu.memory_space<vmem>>, vector<1x16x16xbf16>
    %66 = vector.shape_cast %65 : vector<1x16x16xbf16> to vector<16x16xbf16>
    %67 = arith.truncf %64 : vector<16x128xf32> to vector<16x128xbf16>
    %cst_26 = arith.constant dense<0.000000e+00> : vector<16x128xf32>
    %68 = tpu.matmul %66, %67, %cst_26 {dimension_numbers = #tpu.dot_dimension_numbers<[1], [0], [0], [1], [0, 0, 1, 1], [], []>} : vector<16x16xbf16>, vector<16x128xbf16>, vector<16x128xf32> -> vector<16x128xf32>
    %69 = arith.addf %60, %68 : vector<16x128xf32>
    %c119_i32 = arith.constant 119 : i32
    %70 = tpu.dynamic_rotate %2 by %c119_i32 dim 1 : vector<16x128xf32>, i32 -> vector<16x128xf32>
    %71 = vector.extract_strided_slice %0 {offsets = [8, 0], sizes = [1, 128], strides = [1, 1]} : vector<9x128xf32> to vector<1x128xf32>
    %72 = vector.broadcast %71 : vector<1x128xf32> to vector<16x128xf32>
    %73 = arith.mulf %70, %72 : vector<16x128xf32>
    %c8 = arith.constant 8 : index
    %c0_27 = arith.constant 0 : index
    %c0_28 = arith.constant 0 : index
    %74 = vector.load %arg2[%c8, %c0_27, %c0_28] : memref<9x16x16xbf16, #tpu.memory_space<vmem>>, vector<1x16x16xbf16>
    %75 = vector.shape_cast %74 : vector<1x16x16xbf16> to vector<16x16xbf16>
    %76 = arith.truncf %73 : vector<16x128xf32> to vector<16x128xbf16>
    %cst_29 = arith.constant dense<0.000000e+00> : vector<16x128xf32>
    %77 = tpu.matmul %75, %76, %cst_29 {dimension_numbers = #tpu.dot_dimension_numbers<[1], [0], [0], [1], [0, 0, 1, 1], [], []>} : vector<16x16xbf16>, vector<16x128xbf16>, vector<16x128xf32> -> vector<16x128xf32>
    %78 = arith.addf %69, %77 : vector<16x128xf32>
    %cst_30 = arith.constant dense<0.000000e+00> : vector<16xf32>
    %79 = vector.multi_reduction <add>, %78, %cst_30 [1] : vector<16x128xf32> to vector<16xf32>
    %80 = vector.shape_cast %79 : vector<16xf32> to vector<16x1xf32>
    %cst_31 = arith.constant 7.812500e-03 : f32
    %81 = vector.broadcast %cst_31 : f32 to vector<16x1xf32>
    %82 = arith.mulf %80, %81 : vector<16x1xf32>
    %83 = vector.broadcast %82 : vector<16x1xf32> to vector<16x128xf32>
    %84 = arith.subf %78, %83 : vector<16x128xf32>
    %c0_32 = arith.constant 0 : index
    %c0_33 = arith.constant 0 : index
    %c0_34 = arith.constant 0 : index
    %85 = vector.load %arg4[%c0_32, %c0_33, %c0_34] : memref<1x16x1xf32, #tpu.memory_space<vmem>>, vector<1x16x1xf32>
    %86 = vector.shape_cast %85 : vector<1x16x1xf32> to vector<16x1xf32>
    %87 = vector.shape_cast %82 : vector<16x1xf32> to vector<1x16x1xf32>
    tpu.vector_store %arg4[%c0_32, %c0_33, %c0_34], %87 {strides = array<i32>} : memref<1x16x1xf32, #tpu.memory_space<vmem>>, vector<1x16x1xf32>,
    %88 = arith.mulf %84, %84 : vector<16x128xf32>
    %cst_35 = arith.constant dense<0.000000e+00> : vector<16xf32>
    %89 = vector.multi_reduction <add>, %88, %cst_35 [1] : vector<16x128xf32> to vector<16xf32>
    %90 = vector.shape_cast %89 : vector<16xf32> to vector<16x1xf32>
    %c0_36 = arith.constant 0 : index
    %c0_37 = arith.constant 0 : index
    %c0_38 = arith.constant 0 : index
    %91 = vector.load %arg5[%c0_36, %c0_37, %c0_38] : memref<1x16x1xf32, #tpu.memory_space<vmem>>, vector<1x16x1xf32>
    %92 = vector.shape_cast %91 : vector<1x16x1xf32> to vector<16x1xf32>
    %93 = vector.shape_cast %90 : vector<16x1xf32> to vector<1x16x1xf32>
    tpu.vector_store %arg5[%c0_36, %c0_37, %c0_38], %93 {strides = array<i32>} : memref<1x16x1xf32, #tpu.memory_space<vmem>>, vector<1x16x1xf32>,
    return
  }
  func.func @transform_0(%arg0: i32) -> (i32, i32) {
    %c0_i32 = arith.constant 0 : i32
    %c0_i32_0 = arith.constant 0 : i32
    return %c0_i32, %arg0 : i32, i32
  }
  func.func @transform_1(%arg0: i32) -> (i32, i32, i32) {
    %c0_i32 = arith.constant 0 : i32
    %c0_i32_0 = arith.constant 0 : i32
    %c0_i32_1 = arith.constant 0 : i32
    %c0_i32_2 = arith.constant 0 : i32
    return %c0_i32, %c0_i32_0, %c0_i32_1 : i32, i32, i32
  }
  func.func @transform_2(%arg0: i32) -> (i32, i32) {
    %c0_i32 = arith.constant 0 : i32
    %c0_i32_0 = arith.constant 0 : i32
    %c0_i32_1 = arith.constant 0 : i32
    return %c0_i32, %c0_i32_0 : i32, i32
  }
  func.func @transform_3(%arg0: i32) -> (i32, i32, i32) {
    %c0_i32 = arith.constant 0 : i32
    %c0_i32_0 = arith.constant 0 : i32
    %c0_i32_1 = arith.constant 0 : i32
    return %arg0, %c0_i32, %c0_i32_0 : i32, i32, i32
  }
  func.func @transform_4(%arg0: i32) -> (i32, i32, i32) {
    %c0_i32 = arith.constant 0 : i32
    %c0_i32_0 = arith.constant 0 : i32
    %c0_i32_1 = arith.constant 0 : i32
    return %arg0, %c0_i32, %c0_i32_0 : i32, i32, i32
  }
}

</mosaic_0001>

<bundles_post_ra>
// kernel: tpu_custom_call.1
= control target key start
LH: loop header
LB: loop body
LE: loop exit
PB: predicated region body
PF: predicated region fallthrough
CT: control target
= control target key end

     0   :  { %10 = vsyncpa [#allocation3], 0  ;;  %s1017_s0 = inlined_call_operand.hbm [shape: bf16[16,128], index: 0, kind: input, shape index: {}]   ;;  %s1018_s1 = inlined_call_operand.hbm [shape: bf16[9,16,16], index: 1, kind: input, shape index: {}]   ;;  %s1019_s2 = inlined_call_operand.hbm [shape: f32[9,128], index: 2, kind: input, shape index: {}]   ;;  %s1020_s3 = inlined_call_operand.vmem [shape: f32[1,16,1], index: 3, kind: output, shape index: {0}]   ;;  %s1021_s4 = inlined_call_operand.vmem [shape: f32[1,16,1], index: 4, kind: output, shape index: {1}]  }
   0x1   :  { %11 = vsyncpa [#allocation5], 0  ;;  %s892_s15 = smov [#allocation4]   ;;  %s893_s17 = smov [#allocation2]  }
   0x2   :  { %s29_s16 = sshll.u32 %s892_s15, 4  ;;  %s17_s18 = sshll.u32 %s893_s17, 4  ;;  %s30_s16 = int_to_ptr.vmem [resolvable:$true] %s29_s16  ;;  %s18_s18 = int_to_ptr.vmem [resolvable:$true] %s17_s18 }
   0x3   :  { %s836_s19 = scalar_lea.vmem %s30_s16, 1152  ;;  %p841_p1 = scmp.lt.s32.totalorder %s30_s16, %s30_s16 }
   0x4   :  { %p837_p0 = scmp.ne.s32.totalorder %s30_s16, %s836_s19  ;;  %p842_p2 = scmp.lt.s32.totalorder %s836_s19, %s836_s19 }
   0x6   :  { %p843_p3 = por %p842_p2, %p841_p1 }
   0x8   :  { %p844_p4 = pnand %p843_p3, %p837_p0 }
   0xa   :  { %847 = shalt.err (!%p844_p4)
}
   0xb   :  { %s894_s20 = smov 64   ;;  %s895_s21 = smov 4  }
   0xc   :  { %35 = dma.hbm_to_vmem [thread:$0]  %s1018_s1, 1152, %s30_s16, [#allocation5], %s894_s20, %s894_s20, %s895_s21  }
   0xd   :  { %s856_s24 = scalar_lea.vmem %s18_s18, 128  ;;  %p861_p6 = scmp.lt.s32.totalorder %s18_s18, %s18_s18 }
   0xe   :  { %p857_p5 = scmp.ne.s32.totalorder %s18_s18, %s856_s24  ;;  %p862_p7 = scmp.lt.s32.totalorder %s856_s24, %s856_s24 }
  0x10   :  { %p863_p8 = por %p862_p7, %p861_p6 }
  0x12   :  { %p864_p9 = pnand %p863_p8, %p857_p5 }
  0x14   :  { %867 = shalt.err (!%p864_p9)
}
  0x15   :  { %23 = dma.hbm_to_vmem [thread:$0]  %s1017_s0, 128, %s18_s18, [#allocation3], %s894_s20, %s894_s20, %s895_s21  }
  0x16   :  { %s896_s27 = smov [#allocation6]  }
  0x17   :  { %s41_s28 = sshll.u32 %s896_s27, 4  ;;  %s42_s28 = int_to_ptr.vmem [resolvable:$true] %s41_s28 }
  0x18   :  { %s876_s29 = scalar_lea.vmem %s42_s28, 256  ;;  %p881_p11 = scmp.lt.s32.totalorder %s42_s28, %s42_s28 }
  0x19   :  { %p877_p10 = scmp.ne.s32.totalorder %s42_s28, %s876_s29  ;;  %p882_p12 = scmp.lt.s32.totalorder %s876_s29, %s876_s29 }
  0x1b   :  { %p883_p13 = por %p882_p12, %p881_p11 }
  0x1d   :  { %p884_p0 = pnand %p883_p13, %p877_p10 }
  0x1f   :  { %887 = shalt.err (!%p884_p0)
}
  0x20   :  { %s897_s1 = smov 128   ;;  %s898_s30 = smov 8  }
  0x21   :  { %47 = dma.hbm_to_vmem [thread:$0]  %s1019_s2, 256, %s42_s28, [#allocation5], %s897_s1, %s897_s1, %s898_s30  }
  0x22   :  { %888 = dma.done.wait [#allocation3], 128  }
  0x23   :  { %889 = vsyncadd [#allocation3], 4294967168 }
  0x24   :  { %890 = dma.done.wait [#allocation5], 1408  }
  0x25   :  { %891 = vsyncadd [#allocation5], 4294965888  ;;  %v899_v0 = vmov 0.0   ;;  %vm900_vm0 = vmmov 0   ;;  %v948_v1 = vld [vmem:[#allocation2] sm:$0xff]   ;;  %s901_s0 = smov 7   ;;  %v68_v5 = vlaneseq }
  0x26   :  { %707 = vmatprep.subr.bf16.mxu0 %v899_v0  ;;  %713 = vmatprep.subr.bf16.mxu1 %v899_v0  ;;  %v62_v2 = vunpack.c.l.bf16 %v948_v1  ;;  %v63_v3 = vunpack.c.h.bf16 %v948_v1  ;;  %s902_s2 = smov 9   ;;  %s903_s7 = smov 1   ;;  %v956_v9 = vld [vmem:[#allocation6] sm:$0xff]  ;;  %vm96_vm1 = vcmask 130048   ;;  %v818_v42 = vld [vmem:[#allocation4] sm:$0xff]   ;;  %v819_v49 = vld [vmem:[#allocation4 + $0x10] sm:$0xff]  }
  0x27   :  { %709 = vmatprep.mubr.msk.bf16.mxu0 %vm900_vm0, %v899_v0  ;;  %715 = vmatprep.mubr.msk.bf16.mxu1 %vm900_vm0, %v899_v0  ;;  %s904_s8 = smov 127   ;;  %s905_s9 = smov 121   ;;  %v952_v6 = vshrl.u32 %v68_v5, 7  ;;  %v817_v33 = vld [vmem:[#allocation4 + $0x8] sm:$0xff]   ;;  %v821_v58 = vld [vmem:[#allocation4 + $0x18] sm:$0xff]   ;;  %vm648_vm2 = vcmask 7168  }
  0x28   :  { %v777_v4 = vpack.i.bf16 %v63_v3, %v62_v2  ;;  %s906_s10 = smov 120   ;;  %s907_s11 = smov 119   ;;  %v822_v3 = vld [vmem:[#allocation4 + $0x20] sm:$0xff]  }
  0x29   :  { %v196_v7 = vsub.s32 2, %v952_v6  ;;  %v83_v8 = vsub.s32 1, %v952_v6  ;;  %v70_v10 = vsub.s32 0, %v952_v6  ;;  %v261_v15 = vsub.s32 3, %v952_v6 }
  0x2a   :  { %778 = vrot.lane.b32.xlu0 %v777_v4, %s898_s30  ;;  %788 = vrot.lane.b32.xlu1 %v777_v4, %s901_s0  ;;  %v386_v37 = vsub.s32 5, %v952_v6  ;;  %v451_v43 = vsub.s32 6, %v952_v6  ;;  %v516_v52 = vsub.s32 7, %v952_v6 }
  0x2b   :  { %v197_v11 = vrot.slane %v956_v9, %v196_v7  ;;  %v84_v12 = vrot.slane %v956_v9, %v83_v8  ;;  %v71_v20 = vrot.slane %v956_v9, %v70_v10  ;;  %v262_v27 = vrot.slane %v956_v9, %v261_v15  ;;  %v825_v15 = vld [vmem:[#allocation4 + $0x38] sm:$0xff]  }
  0x2c   :  { %v387_v47 = vrot.slane %v956_v9, %v386_v37  ;;  %v452_v51 = vrot.slane %v956_v9, %v451_v43  ;;  %v517_v59 = vrot.slane %v956_v9, %v516_v52  ;;  %v823_v9 = vld [vmem:[#allocation4 + $0x28] sm:$0xff]  }
  0x2e   :  { %783 = vrot.lane.b32.xlu0 %v777_v4, %s902_s2  ;;  %793 = vrot.lane.b32.xlu1 %v777_v4, %s903_s7 }
  0x32   :  { %798 = vrot.lane.b32.xlu0 %v777_v4, %s904_s8  ;;  %803 = vrot.lane.b32.xlu1 %v777_v4, %s905_s9 }
  0x36   :  { %808 = vrot.lane.b32.xlu0 %v777_v4, %s906_s10  ;;  %813 = vrot.lane.b32.xlu1 %v777_v4, %s907_s11 }
  0x9c   :  { %v779_v13 = vpop.permute.xlu0 %778  ;;  %v789_v14 = vpop.permute.xlu1 %788 }
  0x9d   :  { %v781_v16 = vunpack.i.h.bf16 %v779_v13  ;;  %v780_v17 = vunpack.i.l.bf16 %v779_v13  ;;  %v791_v18 = vunpack.i.h.bf16 %v789_v14  ;;  %v790_v19 = vunpack.i.l.bf16 %v789_v14  ;;  %v824_v13 = vld [vmem:[#allocation4 + $0x30] sm:$0xff]  }
  0x9f   :  { %v198_v21 = vmul.f32 %v790_v19, %v197_v11  ;;  %v199_v22 = vmul.f32 %v791_v18, %v197_v11  ;;  %v85_v23 = vmul.f32 %v780_v17, %v84_v12  ;;  %v86_v24 = vmul.f32 %v781_v16, %v84_v12  ;;  %v826_v16 = vld [vmem:[#allocation4 + $0x40] sm:$0xff]  }
  0xa0   :  { %v784_v25 = vpop.permute.xlu0 %783  ;;  %v794_v26 = vpop.permute.xlu1 %793 }
  0xa1   :  { %v786_v28 = vunpack.i.h.bf16 %v784_v25  ;;  %v785_v29 = vunpack.i.l.bf16 %v784_v25  ;;  %v90_v30 = vpack.c.bf16 %v86_v24, %v85_v23  ;;  %v796_v31 = vunpack.i.h.bf16 %v794_v26 }
  0xa2   :  { %v795_v32 = vunpack.i.l.bf16 %v794_v26  ;;  %v203_v34 = vpack.c.bf16 %v199_v22, %v198_v21 }
  0xa3   :  { %708 = vmatpush3.bf16.msra.mxu0 %v90_v30  ;;  %v72_v35 = vmul.f32 %v785_v29, %v71_v20  ;;  %v73_v36 = vmul.f32 %v786_v28, %v71_v20  ;;  %v264_v39 = vmul.f32 %v796_v31, %v262_v27 }
  0xa4   :  { %v263_v38 = vmul.f32 %v795_v32, %v262_v27  ;;  %719 = vmatprep.subr.bf16.mxu0 %v899_v0  ;;  %v799_v40 = vpop.permute.xlu0 %798  ;;  %v804_v48 = vpop.permute.xlu1 %803 }
  0xa5   :  { %v76_v41 = vpack.c.bf16 %v73_v36, %v72_v35  ;;  %v801_v45 = vunpack.i.h.bf16 %v799_v40  ;;  %v800_v46 = vunpack.i.l.bf16 %v799_v40  ;;  %v806_v50 = vunpack.i.h.bf16 %v804_v48 }
  0xa6   :  { %710 = vmatmul.mubr.msk.bf16.vlgmr.msra.gmra.mxu0 %vm96_vm1, %v817_v33  ;;  %v268_v44 = vpack.c.bf16 %v264_v39, %v263_v38  ;;  %v805_v55 = vunpack.i.l.bf16 %v804_v48 }
  0xa7   :  { %714 = vmatpush3.bf16.msra.mxu1 %v76_v41  ;;  %720 = vmatpush3.bf16.msra.mxu0 %v203_v34  ;;  %v388_v53 = vmul.f32 %v800_v46, %v387_v47  ;;  %v389_v54 = vmul.f32 %v801_v45, %v387_v47  ;;  %v454_v57 = vmul.f32 %v806_v50, %v452_v51 }
  0xa8   :  { %725 = vmatprep.subr.bf16.mxu1 %v899_v0  ;;  %721 = vmatprep.mubr.msk.bf16.mxu0 %vm900_vm0, %v899_v0  ;;  %v809_v56 = vpop.permute.xlu0 %808  ;;  %v453_v61 = vmul.f32 %v805_v55, %v452_v51  ;;  %v814_v2 = vpop.permute.xlu1 %813 }
  0xa9   :  { %731 = vmatprep.subr.bf16.mxu0 %v899_v0  ;;  %v393_v60 = vpack.c.bf16 %v389_v54, %v388_v53  ;;  %v811_v62 = vunpack.i.h.bf16 %v809_v56  ;;  %v810_v63 = vunpack.i.l.bf16 %v809_v56  ;;  %v816_v4 = vunpack.i.h.bf16 %v814_v2 }
  0xaa   :  { %716 = vmatmul.mubr.msk.bf16.vlgmr.msra.gmra.mxu1 %vm96_vm1, %v818_v42  ;;  %v458_v5 = vpack.c.bf16 %v454_v57, %v453_v61  ;;  %v815_v8 = vunpack.i.l.bf16 %v814_v2 }
  0xab   :  { %726 = vmatpush3.bf16.msra.mxu1 %v268_v44  ;;  %727 = vmatprep.mubr.msk.bf16.mxu1 %vm900_vm0, %v899_v0  ;;  %v518_v6 = vmul.f32 %v810_v63, %v517_v59  ;;  %v519_v7 = vmul.f32 %v811_v62, %v517_v59 }
  0xac   :  { %737 = vmatprep.subr.bf16.mxu1 %v899_v0 }
  0xad   :  { %v523_v10 = vpack.c.bf16 %v519_v7, %v518_v6 }
  0xae   :  { %722 = vmatmul.mubr.msk.bf16.vlgmr.msra.gmra.mxu0 %vm96_vm1, %v819_v49 }
  0xaf   :  { %732 = vmatpush3.bf16.msra.mxu0 %v948_v1  ;;  %733 = vmatprep.mubr.msk.bf16.mxu0 %vm900_vm0, %v899_v0  ;;  %v686_v1 = vld [vmem:[#allocation6 + $0x8] ss:$0 sm:$0xff] }
  0xb0   :  { %743 = vmatprep.subr.bf16.mxu0 %v899_v0  ;;  %v583_v11 = vmul.f32 %v815_v8, %v686_v1  ;;  %v584_v12 = vmul.f32 %v816_v4, %v686_v1 }
  0xb2   :  { %728 = vmatmul.mubr.msk.bf16.vlgmr.msra.gmra.mxu1 %vm96_vm1, %v821_v58  ;;  %v588_v14 = vpack.c.bf16 %v584_v12, %v583_v11 }
  0xb3   :  { %738 = vmatpush3.bf16.msra.mxu1 %v393_v60  ;;  %739 = vmatprep.mubr.msk.bf16.mxu1 %vm900_vm0, %v899_v0 }
  0xb4   :  { %749 = vmatprep.subr.bf16.mxu1 %v899_v0 }
  0xb6   :  { %734 = vmatmul.mubr.msk.bf16.vlgmr.msra.gmra.mxu0 %vm96_vm1, %v822_v3 }
  0xb7   :  { %744 = vmatpush3.bf16.msra.mxu0 %v458_v5  ;;  %745 = vmatprep.mubr.msk.bf16.mxu0 %vm900_vm0, %v899_v0 }
  0xb8   :  { %755 = vmatprep.subr.bf16.mxu0 %v899_v0 }
  0xba   :  { %740 = vmatmul.mubr.msk.bf16.vlgmr.msra.gmra.mxu1 %vm96_vm1, %v823_v9 }
  0xbb   :  { %750 = vmatpush3.bf16.msra.mxu1 %v523_v10  ;;  %751 = vmatprep.mubr.msk.bf16.mxu1 %vm900_vm0, %v899_v0 }
  0xbe   :  { %746 = vmatmul.mubr.msk.bf16.vlgmr.msra.gmra.mxu0 %vm96_vm1, %v824_v13 }
  0xbf   :  { %756 = vmatpush3.bf16.msra.mxu0 %v588_v14  ;;  %757 = vmatprep.mubr.msk.bf16.mxu0 %vm900_vm0, %v899_v0 }
  0xc2   :  { %752 = vmatmul.mubr.msk.bf16.vlgmr.msra.gmra.mxu1 %vm96_vm1, %v825_v15 }
  0xc6   :  { %758 = vmatmul.mubr.msk.bf16.vlgmr.msra.gmra.mxu0 %vm96_vm1, %v826_v16 }
 0x166   :  { %v134_v17 = vpop.f32.mrf.mxu0 }
 0x168   :  { %v711_v18 = vpop.f32.mrf.mxu0 }
 0x16a   :  { %v137_v19 = vpop.f32.mrf.mxu0  ;;  %v183_v20 = vpop.f32.mrf.mxu1 }
 0x16b   :  { %v184_v34 = vadd.f32 %v183_v20, %v134_v17 }
 0x16c   :  { %v712_v21 = vpop.f32.mrf.mxu0  ;;  %v717_v22 = vpop.f32.mrf.mxu1 }
 0x16e   :  { %v186_v23 = vpop.f32.mrf.mxu1  ;;  %v246_v24 = vpop.f32.mrf.mxu0 }
 0x16f   :  { %v253_v37 = vadd.f32 %v246_v24, %v184_v34  ;;  %v187_v40 = vadd.f32 %v186_v23, %v137_v19 }
 0x170   :  { %v718_v25 = vpop.f32.mrf.mxu1  ;;  %v723_v26 = vpop.f32.mrf.mxu0 }
 0x172   :  { %v249_v27 = vpop.f32.mrf.mxu0  ;;  %v311_v28 = vpop.f32.mrf.mxu1 }
 0x173   :  { %v318_v41 = vadd.f32 %v311_v28, %v253_v37  ;;  %v254_v44 = vadd.f32 %v249_v27, %v187_v40 }
 0x174   :  { %v724_v29 = vpop.f32.mrf.mxu0  ;;  %v729_v30 = vpop.f32.mrf.mxu1 }
 0x176   :  { %v314_v0 = vpop.f32.mrf.mxu1  ;;  %v371_v31 = vpop.f32.mrf.mxu0 }
 0x177   :  { %v378_v45 = vadd.f32 %v371_v31, %v318_v41  ;;  %v319_v48 = vadd.f32 %v314_v0, %v254_v44 }
 0x178   :  { %v730_v32 = vpop.f32.mrf.mxu1  ;;  %v735_v33 = vpop.f32.mrf.mxu0 }
 0x17a   :  { %v374_v35 = vpop.f32.mrf.mxu0  ;;  %v436_v36 = vpop.f32.mrf.mxu1 }
 0x17b   :  { %v443_v49 = vadd.f32 %v436_v36, %v378_v45  ;;  %v379_v52 = vadd.f32 %v374_v35, %v319_v48 }
 0x17c   :  { %v736_v38 = vpop.f32.mrf.mxu0  ;;  %v741_v39 = vpop.f32.mrf.mxu1 }
 0x17e   :  { %v439_v42 = vpop.f32.mrf.mxu1  ;;  %v501_v43 = vpop.f32.mrf.mxu0 }
 0x17f   :  { %v508_v53 = vadd.f32 %v501_v43, %v443_v49  ;;  %v444_v56 = vadd.f32 %v439_v42, %v379_v52 }
 0x180   :  { %v742_v46 = vpop.f32.mrf.mxu1  ;;  %v747_v47 = vpop.f32.mrf.mxu0 }
 0x182   :  { %v504_v50 = vpop.f32.mrf.mxu0  ;;  %v566_v51 = vpop.f32.mrf.mxu1 }
 0x183   :  { %v573_v57 = vadd.f32 %v566_v51, %v508_v53  ;;  %v509_v60 = vadd.f32 %v504_v50, %v444_v56 }
 0x184   :  { %v748_v54 = vpop.f32.mrf.mxu0  ;;  %v753_v55 = vpop.f32.mrf.mxu1 }
 0x186   :  { %v569_v58 = vpop.f32.mrf.mxu1  ;;  %v631_v59 = vpop.f32.mrf.mxu0 }
 0x187   :  { %v638_v61 = vadd.f32 %v631_v59, %v573_v57  ;;  %v574_v2 = vadd.f32 %v569_v58, %v509_v60 }
 0x188   :  { %v754_v62 = vpop.f32.mrf.mxu1  ;;  %v759_v63 = vpop.f32.mrf.mxu0 }
 0x189   :  { %640 = vadd.xlane.f32.xlu0 %v638_v61 }
 0x18a   :  { %v634_v3 = vpop.f32.mrf.mxu0 }
 0x18b   :  { %v639_v4 = vadd.f32 %v634_v3, %v574_v2 }
 0x18c   :  { %v760_v5 = vpop.f32.mrf.mxu0 }
 0x18d   :  { %642 = vadd.xlane.f32.xlu1 %v639_v4 }
 0x212   :  { %v641_v6 = vpop.xlane.xlu0 %640 }
 0x213   :  { %v644_v7 = vmul.f32 0.0078125, %v641_v6 }
 0x215   :  { %649 = vst.msk [vmem:[%s1020_s3] sm:$0xff] %vm648_vm2, %v644_v7  ;;  %v646_v8 = vsub.f32 %v638_v61, %v644_v7 }
 0x216   :  { %v643_v1 = vpop.xlane.xlu1 %642 }
 0x217   :  { %v645_v9 = vmul.f32 0.0078125, %v643_v1  ;;  %v651_v10 = vmul.f32 %v646_v8, %v646_v8 }
 0x219   :  { %v647_v11 = vsub.f32 %v639_v4, %v645_v9  ;;  %650 = vst.msk [vmem:[%s1020_s3 + $0x8] sm:$0xff] %vm648_vm2, %v645_v9  ;;  %653 = vadd.xlane.f32.xlu0 %v651_v10 }
 0x21b   :  { %v652_v12 = vmul.f32 %v647_v11, %v647_v11 }
 0x21d   :  { %655 = vadd.xlane.f32.xlu0 %v652_v12 }
 0x2a2   :  { %v654_v13 = vpop.xlane.xlu0 %653 }
 0x2a3   :  { %657 = vst.msk [vmem:[%s1021_s4] sm:$0xff] %vm648_vm2, %v654_v13 }
 0x2a6   :  { %v656_v14 = vpop.xlane.xlu0 %655 }
 0x2a7   :  { %658 = vst.msk [vmem:[%s1021_s4 + $0x8] sm:$0xff] %vm648_vm2, %v656_v14 }
 0x2a8   :  { %667 = vsyncpa [#allocation3], 1 }
 0x2a9   :  { %668 = vsyncpa [#allocation5], 1 }

</bundles_post_ra>
